<compile_context>
chip_gen: v7x
topology: tpu7x:2x2x1
jax: 0.10.0
libtpu: 0.0.40
codegen_flags: <defaults>
</compile_context>

<pallas_src>
import functools

import jax
import jax.numpy as jnp
from jax.experimental import pallas as pl
from jax.experimental.pallas import tpu as pltpu


# ------------------------------ helpers ------------------------------------ #
def _round_up(x, m):
    return ((x + m - 1) // m) * m


def _pad2d(a, rows, cols):
    return jnp.pad(a, ((0, rows - a.shape[0]), (0, cols - a.shape[1])))


def _vmem_limit_bytes():
    # ~5/8 of physical VMEM, capped: ~40 MiB on v7x (64 MiB), ~80 MiB on v5e/v6e (128 MiB).
    try:
        cap = pltpu.get_tpu_info().vmem_capacity_bytes
    except Exception:
        cap = 64 * 1024 * 1024
    return int(min(cap * 5 // 8, 100 * 1024 * 1024))


_VMEM_LIMIT = _vmem_limit_bytes()


# ---------------------------- Pallas kernels -------------------------------- #
def xw_kernel(x_ref, w_ref, out_ref):
    """Per-layer feature transform: out = x @ W (bf16 x bf16 -> f32 acc -> bf16)."""
    out_ref[...] = jnp.dot(
        x_ref[...], w_ref[...], preferred_element_type=jnp.float32
    ).astype(out_ref.dtype)


def gcn_prop_kernel(adj_ref, xw_ref, b_ref, out_ref, acc_ref, *,
                    apply_relu, xw_resident, tk):
    """out[i] = maybe_relu( sum_k adj[i,k] @ XW[k] + b ); k is grid axis 1."""
    k = pl.program_id(1)

    @pl.when(k == 0)
    def _():
        acc_ref[...] = jnp.zeros_like(acc_ref)

    if xw_resident:
        start = pl.multiple_of(k * tk, tk)
        xw = xw_ref[pl.ds(start, tk), :]
    else:
        xw = xw_ref[...]
    acc_ref[...] += jnp.dot(adj_ref[...], xw, preferred_element_type=jnp.float32)

    @pl.when(k == pl.num_programs(1) - 1)
    def _():
        h = acc_ref[...] + b_ref[...]            # f32 + f32
        if apply_relu:
            h = jnp.maximum(h, 0.0)
        out_ref[...] = h.astype(out_ref.dtype)


def gcn_prop_pool_head_kernel(adj_ref, xw_ref, b_ref, pool_ref, wl_ref, bl_ref,
                              out_ref, acc_ref, pooled_ref, *, xw_resident, tk):
    """Fused layer 3: h = adj @ XW + b (no ReLU), pooled += pool_tile @ h per row
    tile, logits = pooled @ wl + bl on the final grid step (eval dropout = id)."""
    i = pl.program_id(0)
    k = pl.program_id(1)
    n_i = pl.num_programs(0)
    n_k = pl.num_programs(1)

    @pl.when((i == 0) & (k == 0))
    def _():
        pooled_ref[...] = jnp.zeros_like(pooled_ref)

    @pl.when(k == 0)
    def _():
        acc_ref[...] = jnp.zeros_like(acc_ref)

    if xw_resident:
        start = pl.multiple_of(k * tk, tk)
        xw = xw_ref[pl.ds(start, tk), :]
    else:
        xw = xw_ref[...]
    acc_ref[...] += jnp.dot(adj_ref[...], xw, preferred_element_type=jnp.float32)

    @pl.when(k == n_k - 1)
    def _():
        h = acc_ref[...] + b_ref[...]            # layer-3 node embeddings, f32
        pooled_ref[...] += jnp.dot(pool_ref[...], h,
                                   preferred_element_type=jnp.float32)

    @pl.when((i == n_i - 1) & (k == n_k - 1))
    def _():
        logits = jnp.dot(pooled_ref[...], wl_ref[...],
                         preferred_element_type=jnp.float32)
        out_ref[...] = (logits + bl_ref[...]).astype(out_ref.dtype)


# ---------------------------- pallas_call wrappers --------------------------- #
def _feature_transform(x, w, *, tm):
    Np, Fp = x.shape
    Hp = w.shape[1]
    return pl.pallas_call(
        xw_kernel,
        out_shape=jax.ShapeDtypeStruct((Np, Hp), jnp.bfloat16),
        grid_spec=pltpu.PrefetchScalarGridSpec(
            num_scalar_prefetch=0,
            grid=(Np // tm,),
            in_specs=[
                pl.BlockSpec((tm, Fp), lambda i: (i, 0)),
                pl.BlockSpec((Fp, Hp), lambda i: (0, 0)),     # resident weight
            ],
            out_specs=pl.BlockSpec((tm, Hp), lambda i: (i, 0)),
        ),
        compiler_params=pltpu.CompilerParams(
            dimension_semantics=("parallel",),
            vmem_limit_bytes=_VMEM_LIMIT,
        ),
        cost_estimate=pl.CostEstimate(
            flops=2 * Np * Fp * Hp, transcendentals=0,
            bytes_accessed=2 * (Np * Fp + Fp * Hp + Np * Hp)),
    )(x, w)


def _gcn_propagate(adj, xw, b, *, apply_relu, tm, tk, xw_resident):
    Np = adj.shape[0]
    Hp = xw.shape[1]
    grid = (Np // tm, Np // tk)
    if xw_resident:
        xw_spec = pl.BlockSpec((Np, Hp), lambda i, k: (0, 0))   # fully VMEM-resident
    else:
        xw_spec = pl.BlockSpec((tk, Hp), lambda i, k: (k, 0))   # k-tiled fallback

    return pl.pallas_call(
        functools.partial(gcn_prop_kernel, apply_relu=apply_relu,
                          xw_resident=xw_resident, tk=tk),
        out_shape=jax.ShapeDtypeStruct((Np, Hp), jnp.bfloat16),
        grid_spec=pltpu.PrefetchScalarGridSpec(
            num_scalar_prefetch=0,
            grid=grid,
            in_specs=[
                pl.BlockSpec((tm, tk), lambda i, k: (i, k)),    # adjacency tile
                xw_spec,                                        # precomputed XW
                pl.BlockSpec((1, Hp), lambda i, k: (0, 0)),     # bias (f32, resident)
            ],
            out_specs=pl.BlockSpec((tm, Hp), lambda i, k: (i, 0)),
            scratch_shapes=[pltpu.VMEM((tm, Hp), jnp.float32)],
        ),
        compiler_params=pltpu.CompilerParams(
            dimension_semantics=("parallel", "arbitrary"),
            vmem_limit_bytes=_VMEM_LIMIT,
        ),
        cost_estimate=pl.CostEstimate(
            flops=2 * Np * Np * Hp, transcendentals=0,
            bytes_accessed=2 * (Np * Np + 2 * Np * Hp) + 4 * Hp),
    )(adj, xw, b)


def _gcn_pool_head(adj, xw, b, pool, wl, bl, *, tm, tk, xw_resident):
    Np = adj.shape[0]
    Hp = xw.shape[1]
    Gp = pool.shape[0]
    Cp = wl.shape[1]
    grid = (Np // tm, Np // tk)
    if xw_resident:
        xw_spec = pl.BlockSpec((Np, Hp), lambda i, k: (0, 0))
    else:
        xw_spec = pl.BlockSpec((tk, Hp), lambda i, k: (k, 0))

    return pl.pallas_call(
        functools.partial(gcn_prop_pool_head_kernel, xw_resident=xw_resident, tk=tk),
        out_shape=jax.ShapeDtypeStruct((Gp, Cp), jnp.float32),
        grid_spec=pltpu.PrefetchScalarGridSpec(
            num_scalar_prefetch=0,
            grid=grid,
            in_specs=[
                pl.BlockSpec((tm, tk), lambda i, k: (i, k)),    # adjacency tile
                xw_spec,                                        # precomputed XW
                pl.BlockSpec((1, Hp), lambda i, k: (0, 0)),     # conv3 bias (f32)
                pl.BlockSpec((Gp, tm), lambda i, k: (0, i)),    # pooling column tile (f32)
                pl.BlockSpec((Hp, Cp), lambda i, k: (0, 0)),    # head weight (f32)
                pl.BlockSpec((1, Cp), lambda i, k: (0, 0)),     # head bias (f32)
            ],
            out_specs=pl.BlockSpec((Gp, Cp), lambda i, k: (0, 0)),
            scratch_shapes=[pltpu.VMEM((tm, Hp), jnp.float32),
                            pltpu.VMEM((Gp, Hp), jnp.float32)],
        ),
        compiler_params=pltpu.CompilerParams(
            # pooled accumulator spans row tiles -> both axes must stay sequential.
            dimension_semantics=("arbitrary", "arbitrary"),
            vmem_limit_bytes=_VMEM_LIMIT,
        ),
        cost_estimate=pl.CostEstimate(
            flops=2 * Np * Np * Hp + 2 * Gp * Np * Hp + 2 * Gp * Hp * Cp,
            transcendentals=0,
            bytes_accessed=2 * (Np * Np + Np * Hp)
            + 4 * (Gp * Np + Hp * Cp + Gp * Cp + Hp + Cp)),
    )(adj, xw, b, pool, wl, bl)


def gcn_forward(adj, pool, x, params):
    """Full GCN forward on TPU via Pallas."""
    w1, b1, w2, b2, w3, b3, wl, bl = params
    N, F = x.shape
    H = w1.shape[1]
    C = wl.shape[1]
    G = pool.shape[0]

    Fp = _round_up(F, 128)
    Hp = _round_up(H, 128)     # keep at lane minimum; layer is bandwidth-bound
    Cp = _round_up(C, 128)
    Gp = _round_up(G, 8)

    # Large adjacency tiles (512) for the HBM-bound propagation; pad Np to the tile.
    tile = min(512, _round_up(N, 128))
    Np = _round_up(N, tile)
    tm = tk = tile

    # Keep XW fully VMEM-resident when it fits comfortably (<= 8 MiB single buffer).
    xw_resident = Np * Hp * 2 <= 8 * 1024 * 1024

    bf = jnp.bfloat16
    f32 = jnp.float32
    adj_p = _pad2d(adj, Np, Np).astype(bf)
    pool_p = _pad2d(pool, Gp, Np).astype(f32)
    x_p = _pad2d(x, Np, Fp).astype(bf)
    w1_p = _pad2d(w1, Fp, Hp).astype(bf)
    w2_p = _pad2d(w2, Hp, Hp).astype(bf)
    w3_p = _pad2d(w3, Hp, Hp).astype(bf)
    wl_p = _pad2d(wl, Hp, Cp).astype(f32)
    b1_p = _pad2d(b1, 1, Hp).astype(f32)
    b2_p = _pad2d(b2, 1, Hp).astype(f32)
    b3_p = _pad2d(b3, 1, Hp).astype(f32)
    bl_p = _pad2d(bl, 1, Cp).astype(f32)

    # Layer 1: XW once, then tiled propagation (+ReLU).
    xw = _feature_transform(x_p, w1_p, tm=tm)
    h = _gcn_propagate(adj_p, xw, b1_p, apply_relu=True,
                       tm=tm, tk=tk, xw_resident=xw_resident)
    # Layer 2.
    xw = _feature_transform(h, w2_p, tm=tm)
    h = _gcn_propagate(adj_p, xw, b2_p, apply_relu=True,
                       tm=tm, tk=tk, xw_resident=xw_resident)
    # Layer 3 fused with global_mean_pool + dropout(eval, identity) + Linear head.
    xw = _feature_transform(h, w3_p, tm=tm)
    out = _gcn_pool_head(adj_p, xw, b3_p, pool_p, wl_p, bl_p,
                         tm=tm, tk=tk, xw_resident=xw_resident)

    return out[:G, :C]


# ------------------------------ JAX glue ------------------------------------- #
def build_normalized_adjacency(edge_index, num_nodes):
    """A_hat = D^{-1/2} (A + I) D^{-1/2}, dense float32 (PyG gcn_norm defaults)."""
    src, dst = edge_index
    adj = jnp.zeros((num_nodes, num_nodes), jnp.float32).at[dst, src].set(1.0)
    eye = jnp.eye(num_nodes, dtype=jnp.float32)
    adj = adj * (1.0 - eye) + eye          # drop explicit self-loops, add fill=1 loops
    deg = jnp.sum(adj, axis=1)
    dinv = jnp.where(deg > 0, 1.0 / jnp.sqrt(deg), 0.0)
    return adj * dinv[:, None] * dinv[None, :]


def build_mean_pool(batch, num_graphs):
    """(G, N) matrix with P[g, n] = 1/|graph g| if batch[n] == g."""
    onehot = (batch[None, :] == jnp.arange(num_graphs)[:, None]).astype(jnp.float32)
    counts = jnp.maximum(jnp.sum(onehot, axis=1, keepdims=True), 1.0)
    return onehot / counts


def init_params(key, num_features, hidden, num_classes):
    ks = jax.random.split(key, 4)

    def glorot(k, fan_in, fan_out):
        lim = jnp.sqrt(6.0 / (fan_in + fan_out))
        return jax.random.uniform(k, (fan_in, fan_out), jnp.float32, -lim, lim)

    w1 = glorot(ks[0], num_features, hidden)
    w2 = glorot(ks[1], hidden, hidden)
    w3 = glorot(ks[2], hidden, hidden)
    wl = glorot(ks[3], hidden, num_classes)
    b1 = jnp.zeros((1, hidden), jnp.float32)
    b2 = jnp.zeros((1, hidden), jnp.float32)
    b3 = jnp.zeros((1, hidden), jnp.float32)
    bl = jnp.zeros((1, num_classes), jnp.float32)
    return (w1, b1, w2, b2, w3, b3, wl, bl)


def reference_forward(adj, pool, x, params):
    w1, b1, w2, b2, w3, b3, wl, bl = params
    h = jnp.maximum(adj @ (x @ w1) + b1, 0.0)
    h = jnp.maximum(adj @ (h @ w2) + b2, 0.0)
    h = adj @ (h @ w3) + b3
    return (pool @ h) @ wl + bl


# ------------------------------ main ----------------------------------------- #
if __name__ == "__main__":
    key = jax.random.PRNGKey(0)

    num_nodes = 16          # small graph batch: 2 graphs of 8 nodes each
    num_features = 8        # dataset.num_node_features
    hidden = 32             # hidden_channels
    num_classes = 4         # dataset.num_classes
    num_graphs = 2

    kx, kp = jax.random.split(key)
    x = jax.random.normal(kx, (num_nodes, num_features), jnp.float32)

    # deterministic edge_index: a directed ring within each graph (made symmetric)
    nodes_per_graph = num_nodes // num_graphs
    srcs, dsts = [], []
    for g in range(num_graphs):
        base = g * nodes_per_graph
        for i in range(nodes_per_graph):
            a = base + i
            b = base + (i + 1) % nodes_per_graph
            srcs += [a, b]
            dsts += [b, a]
    edge_index = jnp.array([srcs, dsts], dtype=jnp.int32)

    # batch vector assigning nodes to graphs
    batch = jnp.repeat(jnp.arange(num_graphs, dtype=jnp.int32), nodes_per_graph)

    adj = build_normalized_adjacency(edge_index, num_nodes)
    pool = build_mean_pool(batch, num_graphs)
    params = init_params(kp, num_features, hidden, num_classes)

    out = gcn_forward(adj, pool, x, params)
    out = jax.block_until_ready(out)

    ref = reference_forward(adj, pool, x, params)
    assert out.shape == (num_graphs, num_classes)
    # bf16 matmul inputs with f32 accumulation -> relative error ~1e-2 vs pure-f32 reference.
    assert jnp.allclose(out, ref, atol=5e-2, rtol=5e-2), "mismatch vs JAX reference"

    print("KERNEL_OK")
</pallas_src>

<mosaic_0001>
module attributes {stable_mosaic.version = 11 : i64} {
  func.func @xw_kernel(%arg0: i32, %arg1: memref<128x128xbf16, #tpu.memory_space<vmem>>, %arg2: memref<128x128xbf16, #tpu.memory_space<vmem>>, %arg3: memref<128x128xbf16, #tpu.memory_space<vmem>>) attributes {dimension_semantics = [#tpu.dimension_semantics<parallel>], iteration_bounds = array<i64: 1>, scalar_prefetch = 0 : i64, scratch_operands = 0 : i64, tpu.core_type = #tpu.core_type<tc>, window_params = [{transform_indices = @transform_0, window_bounds = array<i64: 128, 128>}, {pipeline_mode = #tpu.pipeline_mode<synchronous>, transform_indices = @transform_1, window_bounds = array<i64: 128, 128>}, {transform_indices = @transform_2, window_bounds = array<i64: 128, 128>}]} {
    %c0 = arith.constant 0 : index
    %c0_0 = arith.constant 0 : index
    %0 = vector.load %arg1[%c0, %c0_0] : memref<128x128xbf16, #tpu.memory_space<vmem>>, vector<128x128xbf16>
    %c0_1 = arith.constant 0 : index
    %c0_2 = arith.constant 0 : index
    %1 = vector.load %arg2[%c0_1, %c0_2] : memref<128x128xbf16, #tpu.memory_space<vmem>>, vector<128x128xbf16>
    %cst = arith.constant dense<0.000000e+00> : vector<128x128xf32>
    %2 = tpu.matmul %0, %1, %cst {dimension_numbers = #tpu.dot_dimension_numbers<[1], [0], [0], [1], [0, 0, 1, 1], [], []>} : vector<128x128xbf16>, vector<128x128xbf16>, vector<128x128xf32> -> vector<128x128xf32>
    %3 = arith.truncf %2 : vector<128x128xf32> to vector<128x128xbf16>
    %c0_3 = arith.constant 0 : index
    %c0_4 = arith.constant 0 : index
    %4 = vector.load %arg3[%c0_3, %c0_4] : memref<128x128xbf16, #tpu.memory_space<vmem>>, vector<128x128xbf16>
    tpu.vector_store %arg3[%c0_3, %c0_4], %3 {strides = array<i32>} : memref<128x128xbf16, #tpu.memory_space<vmem>>, vector<128x128xbf16>,
    return
  }
  func.func @transform_0(%arg0: i32) -> (i32, i32) {
    %c0_i32 = arith.constant 0 : i32
    %c0_i32_0 = arith.constant 0 : i32
    return %arg0, %c0_i32 : i32, i32
  }
  func.func @transform_1(%arg0: i32) -> (i32, i32) {
    %c0_i32 = arith.constant 0 : i32
    %c0_i32_0 = arith.constant 0 : i32
    %c0_i32_1 = arith.constant 0 : i32
    return %c0_i32, %c0_i32_0 : i32, i32
  }
  func.func @transform_2(%arg0: i32) -> (i32, i32) {
    %c0_i32 = arith.constant 0 : i32
    %c0_i32_0 = arith.constant 0 : i32
    return %arg0, %c0_i32 : i32, i32
  }
}

</mosaic_0001>

<bundles_post_ra>
// kernel: tpu_custom_call.1
= control target key start
LH: loop header
LB: loop body
LE: loop exit
PB: predicated region body
PF: predicated region fallthrough
CT: control target
= control target key end

     0   :  { %7 = vsyncpa [#allocation3], 0  ;;  %s681_s0 = inlined_call_operand.hbm [shape: bf16[128,128], index: 0, kind: input, shape index: {}]   ;;  %s682_s1 = inlined_call_operand.hbm [shape: bf16[128,128], index: 1, kind: input, shape index: {}]   ;;  %s683_s2 = inlined_call_operand.hbm [shape: bf16[128,128], index: 2, kind: output, shape index: {}]  }
   0x1   :  { %8 = vsyncpa [#allocation6], 0 }
   0x2   :  { %9 = vsyncpa [#allocation4], 0  ;;  %s616_s9 = smov [#allocation2]   ;;  %s544_s13 = scalar_lea.hbm %s681_s0, 1024 }
   0x3   :  { %s15_s10 = sshll.u32 %s616_s9, 4  ;;  %p545_p0 = scmp.ne.s32.totalorder %s681_s0, %s544_s13  ;;  %s16_s10 = int_to_ptr.vmem [resolvable:$true] %s15_s10 }
   0x4   :  { %p548_p1 = scmp.lt.u32.totalorder %s544_s13, %s681_s0 }
   0x6   :  { %p550_p2 = pnand %p548_p1, %p545_p0 }
   0x8   :  { %553 = shalt.err (!%p550_p2)
}
   0x9   :  { %s554_s18 = scalar_lea.vmem %s16_s10, 1024  ;;  %p559_p4 = scmp.lt.s32.totalorder %s16_s10, %s16_s10 }
   0xa   :  { %p555_p3 = scmp.ne.s32.totalorder %s16_s10, %s554_s18  ;;  %p560_p5 = scmp.lt.s32.totalorder %s554_s18, %s554_s18 }
   0xc   :  { %p561_p6 = por %p560_p5, %p559_p4 }
   0xe   :  { %p562_p7 = pnand %p561_p6, %p555_p3 }
  0x10   :  { %565 = shalt.err (!%p562_p7)
}
  0x11   :  { %s617_s19 = smov 64   ;;  %s618_s20 = smov 4  }
  0x12   :  { %21 = dma.hbm_to_vmem [thread:$0]  %s681_s0, 1024, %s16_s10, [#allocation3], %s617_s19, %s617_s19, %s618_s20  }
  0x13   :  { %s619_s23 = smov [#allocation5]   ;;  %s566_s27 = scalar_lea.hbm %s682_s1, 1024 }
  0x14   :  { %s27_s24 = sshll.u32 %s619_s23, 4  ;;  %p567_p8 = scmp.ne.s32.totalorder %s682_s1, %s566_s27  ;;  %s28_s24 = int_to_ptr.vmem [resolvable:$true] %s27_s24 }
  0x15   :  { %p570_p9 = scmp.lt.u32.totalorder %s566_s27, %s682_s1 }
  0x17   :  { %p572_p10 = pnand %p570_p9, %p567_p8 }
  0x19   :  { %575 = shalt.err (!%p572_p10)
}
  0x1a   :  { %s576_s4 = scalar_lea.vmem %s28_s24, 1024  ;;  %p581_p12 = scmp.lt.s32.totalorder %s28_s24, %s28_s24 }
  0x1b   :  { %p577_p11 = scmp.ne.s32.totalorder %s28_s24, %s576_s4  ;;  %p582_p13 = scmp.lt.s32.totalorder %s576_s4, %s576_s4 }
  0x1d   :  { %p583_p0 = por %p582_p13, %p581_p12 }
  0x1f   :  { %p584_p1 = pnand %p583_p0, %p577_p11 }
  0x21   :  { %587 = shalt.err (!%p584_p1)
}
  0x22   :  { %33 = dma.hbm_to_vmem [thread:$0]  %s682_s1, 1024, %s28_s24, [#allocation6], %s617_s19, %s617_s19, %s618_s20  }
  0x23   :  { %610 = dma.done.wait [#allocation3], 1024  }
  0x24   :  { %611 = vsyncadd [#allocation3], 4294966272 }
  0x25   :  { %612 = dma.done.wait [#allocation6], 1024  }
  0x26   :  { %613 = vsyncadd [#allocation6], 4294966272  ;;  %v528_v0 = vld [vmem:[#allocation5] sm:$0xff]   ;;  %v529_v1 = vld [vmem:[#allocation5 + $0x8] sm:$0xff]   ;;  %s620_s1 = smov [#allocation7]  }
  0x27   :  { %475 = vmatprep.subr.bf16.mxu0 %v528_v0  ;;  %507 = vmatprep.subr.bf16.mxu1 %v528_v0  ;;  %v530_v2 = vld [vmem:[#allocation5 + $0x10] sm:$0xff]   ;;  %v531_v3 = vld [vmem:[#allocation5 + $0x18] sm:$0xff]   ;;  %v536_v4 = vld [vmem:[#allocation2] sm:$0xff]   ;;  %s351_s6 = sshll.u32 %s620_s1, 4  ;;  %s352_s6 = int_to_ptr.vmem [resolvable:$true] %s351_s6 }
  0x28   :  { %476 = vmatpush3.bf16.msra.mxu0 %v528_v0  ;;  %515 = vmatpush3.bf16.msra.mxu1 %v528_v0  ;;  %v537_v5 = vld [vmem:[#allocation2 + $0x20] sm:$0xff]   ;;  %v533_v7 = vld [vmem:[#allocation5 + $0x28] sm:$0xff]   ;;  %v534_v8 = vld [vmem:[#allocation5 + $0x30] sm:$0xff]   ;;  %s588_s7 = scalar_lea.vmem %s352_s6, 1024  ;;  %p593_p3 = scmp.lt.s32.totalorder %s352_s6, %s352_s6 }
  0x29   :  { %477 = vmatprep.subr.bf16.mxu0 %v529_v1  ;;  %508 = vmatprep.subr.bf16.mxu1 %v529_v1  ;;  %v532_v6 = vld [vmem:[#allocation5 + $0x20] sm:$0xff]   ;;  %v535_v9 = vld [vmem:[#allocation5 + $0x38] sm:$0xff]   ;;  %v538_v10 = vld [vmem:[#allocation2 + $0x8] sm:$0xff]   ;;  %p589_p2 = scmp.ne.s32.totalorder %s352_s6, %s588_s7  ;;  %p594_p4 = scmp.lt.s32.totalorder %s588_s7, %s588_s7 }
  0x2a   :  { %491 = vmatprep.mubr.bf16.mxu0 %v536_v4  ;;  %499 = vmatprep.mubr.bf16.mxu1 %v537_v5  ;;  %v539_v11 = vld [vmem:[#allocation2 + $0x28] sm:$0xff]   ;;  %v540_v12 = vld [vmem:[#allocation2 + $0x10] sm:$0xff]   ;;  %v542_v14 = vld [vmem:[#allocation2 + $0x18] sm:$0xff]  }
  0x2b   :  { %v541_v13 = vld [vmem:[#allocation2 + $0x30] sm:$0xff]   ;;  %v543_v15 = vld [vmem:[#allocation2 + $0x38] sm:$0xff]   ;;  %p595_p5 = por %p594_p4, %p593_p3 }
  0x2c   :  { %478 = vmatpush3.bf16.msra.mxu0 %v529_v1  ;;  %516 = vmatpush3.bf16.msra.mxu1 %v529_v1 }
  0x2d   :  { %479 = vmatprep.subr.bf16.mxu0 %v530_v2  ;;  %509 = vmatprep.subr.bf16.mxu1 %v530_v2  ;;  %p596_p6 = pnand %p595_p5, %p589_p2 }
  0x30   :  { %480 = vmatpush3.bf16.msra.mxu0 %v530_v2  ;;  %517 = vmatpush3.bf16.msra.mxu1 %v530_v2 }
  0x31   :  { %481 = vmatprep.subr.bf16.mxu0 %v531_v3  ;;  %510 = vmatprep.subr.bf16.mxu1 %v531_v3 }
  0x34   :  { %482 = vmatpush3.bf16.msra.mxu0 %v531_v3  ;;  %518 = vmatpush3.bf16.msra.mxu1 %v531_v3 }
  0x35   :  { %483 = vmatprep.subr.bf16.mxu0 %v532_v6  ;;  %511 = vmatprep.subr.bf16.mxu1 %v532_v6 }
  0x38   :  { %484 = vmatpush3.bf16.msra.mxu0 %v532_v6  ;;  %519 = vmatpush3.bf16.msra.mxu1 %v532_v6 }
  0x39   :  { %485 = vmatprep.subr.bf16.mxu0 %v533_v7  ;;  %512 = vmatprep.subr.bf16.mxu1 %v533_v7 }
  0x3c   :  { %486 = vmatpush3.bf16.msra.mxu0 %v533_v7  ;;  %520 = vmatpush3.bf16.msra.mxu1 %v533_v7 }
  0x3d   :  { %487 = vmatprep.subr.bf16.mxu0 %v534_v8  ;;  %513 = vmatprep.subr.bf16.mxu1 %v534_v8 }
  0x40   :  { %488 = vmatpush3.bf16.msra.mxu0 %v534_v8  ;;  %521 = vmatpush3.bf16.msra.mxu1 %v534_v8 }
  0x41   :  { %489 = vmatprep.subr.bf16.mxu0 %v535_v9  ;;  %514 = vmatprep.subr.bf16.mxu1 %v535_v9 }
  0x44   :  { %490 = vmatpush3.bf16.msra.mxu0 %v535_v9  ;;  %522 = vmatpush3.bf16.msra.mxu1 %v535_v9 }
  0x47   :  { %492 = vmatmul.mubr.bf16.vlgmr.msra.gmra.mrb[0].mxu0 %v538_v10  ;;  %500 = vmatmul.mubr.bf16.vlgmr.msra.gmra.mrb[0].mxu1 %v539_v11 }
  0x48   :  { %495 = vmatprep.mubr.bf16.mxu0 %v540_v12  ;;  %503 = vmatprep.mubr.bf16.mxu1 %v541_v13 }
  0x4f   :  { %496 = vmatmul.mubr.bf16.gmra.mrb[4].mxu0 %v542_v14  ;;  %504 = vmatmul.mubr.bf16.gmra.mrb[4].mxu1 %v543_v15 }
 0x11a   :  { %v493_v16 = vpop.f32.mrb[0].mxu0  ;;  %v501_v17 = vpop.f32.mrb[0].mxu1 }
 0x11b   :  { %v203_v18 = vpop.f32.mrb[1].mxu0  ;;  %v235_v19 = vpop.f32.mrb[1].mxu1 }
 0x11c   :  { %v494_v20 = vpop.f32.mrb[2].mxu0  ;;  %v502_v21 = vpop.f32.mrb[2].mxu1 }
 0x11d   :  { %v420_v22 = vpack.c.bf16 %v494_v20, %v493_v16  ;;  %v440_v23 = vpack.c.bf16 %v502_v21, %v501_v17  ;;  %v206_v24 = vpop.f32.mrb[3].mxu0  ;;  %v238_v25 = vpop.f32.mrb[3].mxu1 }
 0x11e   :  { %v415_v26 = vpack.c.bf16 %v206_v24, %v203_v18  ;;  %v435_v27 = vpack.c.bf16 %v238_v25, %v235_v19 }
 0x11f   :  { %452 = vst [vmem:[#allocation7 + $0x8] sm:$0xff] %v420_v22   ;;  %456 = vst [vmem:[#allocation7 + $0x28] sm:$0xff] %v440_v23  }
 0x120   :  { %416 = vst [vmem:[#allocation7] sm:$0xff] %v415_v26   ;;  %455 = vst [vmem:[#allocation7 + $0x20] sm:$0xff] %v435_v27  }
 0x122   :  { %v497_v28 = vpop.f32.mrb[4].mxu0  ;;  %v505_v29 = vpop.f32.mrb[4].mxu1 }
 0x123   :  { %v219_v30 = vpop.f32.mrb[5].mxu0  ;;  %v251_v31 = vpop.f32.mrb[5].mxu1 }
 0x124   :  { %v498_v32 = vpop.f32.mrb[6].mxu0  ;;  %v506_v33 = vpop.f32.mrb[6].mxu1 }
 0x125   :  { %v430_v34 = vpack.c.bf16 %v498_v32, %v497_v28  ;;  %v450_v35 = vpack.c.bf16 %v506_v33, %v505_v29  ;;  %v222_v36 = vpop.f32.mrb[7].mxu0  ;;  %v254_v37 = vpop.f32.mrb[7].mxu1 }
 0x126   :  { %v425_v38 = vpack.c.bf16 %v222_v36, %v219_v30  ;;  %v445_v39 = vpack.c.bf16 %v254_v37, %v251_v31 }
 0x127   :  { %454 = vst [vmem:[#allocation7 + $0x18] sm:$0xff] %v430_v34   ;;  %458 = vst [vmem:[#allocation7 + $0x38] sm:$0xff] %v450_v35  }
 0x128   :  { %453 = vst [vmem:[#allocation7 + $0x10] sm:$0xff] %v425_v38   ;;  %457 = vst [vmem:[#allocation7 + $0x30] sm:$0xff] %v445_v39  }
 0x129   :  { %599 = shalt.err (!%p596_p6)
}
 0x12a   :  { %s600_s10 = scalar_lea.hbm %s683_s2, 1024 }
 0x12b   :  { %p601_p7 = scmp.ne.s32.totalorder %s683_s2, %s600_s10  ;;  %p604_p8 = scmp.lt.u32.totalorder %s600_s10, %s683_s2 }
 0x12d   :  { %p606_p9 = pnand %p604_p8, %p601_p7 }
 0x12f   :  { %609 = shalt.err (!%p606_p9)
}
 0x130   :  { %357 = dma.vmem_to_hbm [thread:$0]  %s352_s6, 1024, %s683_s2, [#allocation4], %s617_s19, %s617_s19, %s618_s20  }
 0x131   :  { %614 = dma.done.wait [#allocation4], 1024  }
 0x132   :  { %615 = vsyncadd [#allocation4], 4294966272 }
 0x133   :  { %361 = vsyncpa [#allocation3], 1 }
 0x134   :  { %362 = vsyncpa [#allocation6], 1 }
 0x135   :  { %363 = vsyncpa [#allocation4], 1 }

</bundles_post_ra>
